<compile_context>
chip_gen: v6e
topology: v6e:2x2x1
jax: 0.10.0
libtpu: 0.0.40
codegen_flags: <defaults>
</compile_context>

<pallas_src>
import jax
import jax.numpy as jnp
from jax.experimental import pallas as pl
from jax.experimental.pallas import tpu as pltpu


_LANE = 128
_BLOCK_BUDGET_BYTES = 4 * 1024 * 1024   # per-block VMEM budget; 4 blocks x dbl-buffer ~= 32 MiB
_VMEM_LIMIT_BYTES = 48 * 1024 * 1024    # safe on v7x (64 MiB physical) and v5e/v6e (128 MiB)
_MIN_GRID_STEPS = 8                     # >= 4 steps per TensorCore on v7x megacore


def _sublane_pack(dtype):
    """Native sublane tile rows: 8 (f32), 16 (bf16/f16), 32 (int8/fp8)."""
    itemsize = jnp.dtype(dtype).itemsize
    return max(8, 32 // max(itemsize, 1))


def _choose_col_tile(w, itemsize, pack):
    """Largest multiple-of-128 divisor of W whose pack-row block fits the budget."""
    max_cols = max(_LANE, _BLOCK_BUDGET_BYTES // (pack * itemsize))
    if w <= max_cols:
        return w
    n_lane_groups = w // _LANE
    best = _LANE
    for d in range(1, n_lane_groups + 1):
        if n_lane_groups % d == 0:
            cols = d * _LANE
            if cols <= max_cols:
                best = cols
    return best


def _choose_row_tile(rows, tile_w, itemsize, pack, col_tiles):
    """Row tile: multiple of the dtype sublane pack, ~_BLOCK_BUDGET per block,
    shrunk (if the data is large enough) so the grid has >= _MIN_GRID_STEPS."""
    if rows <= pack:
        return rows  # block equals the full extent (always legal)
    budget_rows = max(pack, _BLOCK_BUDGET_BYTES // max(tile_w * itemsize, 1))
    tile = min(budget_rows, rows)
    tile = max(pack, (tile // pack) * pack)
    steps = col_tiles * pl.cdiv(rows, tile)
    if steps < _MIN_GRID_STEPS:
        want_row_tiles = max(1, _MIN_GRID_STEPS // col_tiles)
        cand = (rows // want_row_tiles // pack) * pack
        if cand >= pack:
            tile = min(tile, cand)
    return tile


def _copy2_kernel(x0_ref, x1_ref, s0_ref, s1_ref):
    # Two unmasked, lane-dense block copies per grid step.
    s0_ref[...] = x0_ref[...]
    s1_ref[...] = x1_ref[...]


def _split_lane_aligned(x2d, w):
    """Fast path: W % 128 == 0. Column-tiled, full-width unmasked stores."""
    rows, _ = x2d.shape
    itemsize = jnp.dtype(x2d.dtype).itemsize
    pack = _sublane_pack(x2d.dtype)

    tile_w = _choose_col_tile(w, itemsize, pack)
    col_tiles = w // tile_w
    tile_rows = _choose_row_tile(rows, tile_w, itemsize, pack, col_tiles)
    grid = (pl.cdiv(rows, tile_rows), col_tiles)
    half_block_off = w // tile_w  # block-index offset of the second column half

    in_specs = [
        pl.BlockSpec((tile_rows, tile_w), lambda i, j: (i, j)),
        pl.BlockSpec((tile_rows, tile_w), lambda i, j: (i, j + half_block_off)),
    ]
    out_specs = (
        pl.BlockSpec((tile_rows, tile_w), lambda i, j: (i, j)),
        pl.BlockSpec((tile_rows, tile_w), lambda i, j: (i, j)),
    )
    out_shape = (
        jax.ShapeDtypeStruct((rows, w), x2d.dtype),
        jax.ShapeDtypeStruct((rows, w), x2d.dtype),
    )
    return pl.pallas_call(
        _copy2_kernel,
        out_shape=out_shape,
        grid=grid,
        in_specs=in_specs,
        out_specs=out_specs,
        compiler_params=pltpu.CompilerParams(
            dimension_semantics=("parallel", "parallel"),
            vmem_limit_bytes=_VMEM_LIMIT_BYTES,
        ),
    )(x2d, x2d)


def _split_rows_kernel(x_ref, s0_ref, s1_ref):
    x = x_ref[...]
    w = s0_ref.shape[-1]
    s0_ref[...] = x[:, :w]
    s1_ref[...] = x[:, w:]


def _split_fallback(x2d, w):
    """Fallback for W % 128 != 0: full-width input blocks, W-wide output blocks
    (block last dims equal the full array dims, so always legal)."""
    rows, two_w = x2d.shape
    itemsize = jnp.dtype(x2d.dtype).itemsize
    pack = _sublane_pack(x2d.dtype)
    tile_rows = _choose_row_tile(rows, two_w, itemsize, pack, 1)
    grid = (pl.cdiv(rows, tile_rows),)
    out_shape = (
        jax.ShapeDtypeStruct((rows, w), x2d.dtype),
        jax.ShapeDtypeStruct((rows, w), x2d.dtype),
    )
    return pl.pallas_call(
        _split_rows_kernel,
        out_shape=out_shape,
        grid=grid,
        in_specs=[pl.BlockSpec((tile_rows, two_w), lambda i: (i, 0))],
        out_specs=(
            pl.BlockSpec((tile_rows, w), lambda i: (i, 0)),
            pl.BlockSpec((tile_rows, w), lambda i: (i, 0)),
        ),
        compiler_params=pltpu.CompilerParams(
            dimension_semantics=("parallel",),
            vmem_limit_bytes=_VMEM_LIMIT_BYTES,
        ),
    )(x2d)


def split_cat(x):
    """Replicates Model.forward: returns (concatenated, (split0, split1))."""
    n, c, h, w = x.shape
    assert h == 2, "torch.split(v1, [1, 1], dim=2) requires size 2 along dim 2"

    # cat([x[:,:,0:1], x[:,:,1:2]], dim=2) == x bit-for-bit -> alias, no copy.
    cat = x

    rows = n * c
    x2d = x.reshape(rows, 2 * w)  # row-major faithful: col [0:W] is h=0, [W:2W] is h=1

    if w % _LANE == 0:
        s0_2d, s1_2d = _split_lane_aligned(x2d, w)
    else:
        s0_2d, s1_2d = _split_fallback(x2d, w)

    s0 = s0_2d.reshape(n, c, 1, w)
    s1 = s1_2d.reshape(n, c, 1, w)
    return cat, (s0, s1)


if __name__ == "__main__":
    key = jax.random.PRNGKey(0)
    k0, k1 = jax.random.split(key)

    # Lane-aligned fast path (W multiple of 128).
    x_a = jax.random.normal(k0, (2, 4, 2, 128), dtype=jnp.float32)
    cat_a, (a0, a1) = split_cat(x_a)
    jax.block_until_ready((cat_a, a0, a1))
    assert cat_a.shape == x_a.shape and jnp.array_equal(cat_a, x_a)
    assert a0.shape == (2, 4, 1, 128) and jnp.array_equal(a0, x_a[:, :, 0:1, :])
    assert a1.shape == (2, 4, 1, 128) and jnp.array_equal(a1, x_a[:, :, 1:2, :])

    # Fallback path (W not a multiple of 128).
    x_b = jax.random.normal(k1, (2, 4, 2, 16), dtype=jnp.float32)
    cat_b, (b0, b1) = split_cat(x_b)
    jax.block_until_ready((cat_b, b0, b1))
    assert cat_b.shape == x_b.shape and jnp.array_equal(cat_b, x_b)
    assert b0.shape == (2, 4, 1, 16) and jnp.array_equal(b0, x_b[:, :, 0:1, :])
    assert b1.shape == (2, 4, 1, 16) and jnp.array_equal(b1, x_b[:, :, 1:2, :])

    print("KERNEL_OK")
</pallas_src>

<mosaic_0001>
module attributes {stable_mosaic.version = 11 : i64} {
  func.func @_copy2_kernel(%arg0: i32, %arg1: i32, %arg2: memref<8x128xf32, #tpu.memory_space<vmem>>, %arg3: memref<8x128xf32, #tpu.memory_space<vmem>>, %arg4: memref<8x128xf32, #tpu.memory_space<vmem>>, %arg5: memref<8x128xf32, #tpu.memory_space<vmem>>) attributes {dimension_semantics = [#tpu.dimension_semantics<parallel>, #tpu.dimension_semantics<parallel>], iteration_bounds = array<i64: 1, 1>, scalar_prefetch = 0 : i64, scratch_operands = 0 : i64, tpu.core_type = #tpu.core_type<tc>, window_params = [{transform_indices = @transform_0, window_bounds = array<i64: 8, 128>}, {transform_indices = @transform_1, window_bounds = array<i64: 8, 128>}, {transform_indices = @transform_2, window_bounds = array<i64: 8, 128>}, {transform_indices = @transform_3, window_bounds = array<i64: 8, 128>}]} {
    %c0 = arith.constant 0 : index
    %c0_0 = arith.constant 0 : index
    %0 = vector.load %arg2[%c0, %c0_0] : memref<8x128xf32, #tpu.memory_space<vmem>>, vector<8x128xf32>
    %c0_1 = arith.constant 0 : index
    %c0_2 = arith.constant 0 : index
    %1 = vector.load %arg4[%c0_1, %c0_2] : memref<8x128xf32, #tpu.memory_space<vmem>>, vector<8x128xf32>
    tpu.vector_store %arg4[%c0_1, %c0_2], %0 {strides = array<i32>} : memref<8x128xf32, #tpu.memory_space<vmem>>, vector<8x128xf32>,
    %c0_3 = arith.constant 0 : index
    %c0_4 = arith.constant 0 : index
    %2 = vector.load %arg3[%c0_3, %c0_4] : memref<8x128xf32, #tpu.memory_space<vmem>>, vector<8x128xf32>
    %c0_5 = arith.constant 0 : index
    %c0_6 = arith.constant 0 : index
    %3 = vector.load %arg5[%c0_5, %c0_6] : memref<8x128xf32, #tpu.memory_space<vmem>>, vector<8x128xf32>
    tpu.vector_store %arg5[%c0_5, %c0_6], %2 {strides = array<i32>} : memref<8x128xf32, #tpu.memory_space<vmem>>, vector<8x128xf32>,
    return
  }
  func.func @transform_0(%arg0: i32, %arg1: i32) -> (i32, i32) {
    %c0_i32 = arith.constant 0 : i32
    return %arg0, %arg1 : i32, i32
  }
  func.func @transform_1(%arg0: i32, %arg1: i32) -> (i32, i32) {
    %c1_i32 = arith.constant 1 : i32
    %0 = arith.addi %arg1, %c1_i32 : i32
    %c0_i32 = arith.constant 0 : i32
    return %arg0, %0 : i32, i32
  }
  func.func @transform_2(%arg0: i32, %arg1: i32) -> (i32, i32) {
    %c0_i32 = arith.constant 0 : i32
    return %arg0, %arg1 : i32, i32
  }
  func.func @transform_3(%arg0: i32, %arg1: i32) -> (i32, i32) {
    %c0_i32 = arith.constant 0 : i32
    return %arg0, %arg1 : i32, i32
  }
}

</mosaic_0001>

<bundles_post_ra>
// kernel: tpu_custom_call.1
= control target key start
LH: loop header
LB: loop body
LE: loop exit
PB: predicated region body
PF: predicated region fallthrough
CT: control target
= control target key end

     0   :  { %9 = vsyncpa [#allocation3], 0  ;;  %s209_s0 = inlined_call_operand.hbm [shape: f32[8,256], index: 0, kind: input, shape index: {}]   ;;  %s210_s1 = inlined_call_operand.hbm [shape: f32[8,256], index: 1, kind: input, shape index: {}]   ;;  %s211_s2 = inlined_call_operand.hbm [shape: f32[8,128], index: 2, kind: output, shape index: {0}]   ;;  %s212_s3 = inlined_call_operand.hbm [shape: f32[8,128], index: 3, kind: output, shape index: {1}]  }
   0x1   :  { %10 = vsyncpa [#allocation6], 0 }
   0x2   :  { %11 = vsyncpa [#allocation4], 0 }
   0x3   :  { %12 = vsyncpa [#allocation9], 0  ;;  %s77_s14 = scalar_lea.hbm %s210_s1, 128  ;;  %s173_s15 = smov [#allocation2]  }
   0x4   :  { %s19_s16 = sshll.u32 %s173_s15, 4  ;;  %s174_s17 = smov [#allocation5]   ;;  %s20_s16 = int_to_ptr.vmem [resolvable:$true] %s19_s16 }
   0x5   :  { %s32_s18 = sshll.u32 %s174_s17, 4  ;;  %s90_s19 = scalar_lea.vmem %s20_s16, 128  ;;  %s33_s18 = int_to_ptr.vmem [resolvable:$true] %s32_s18 }
   0x6   :  { %p91_p0 = scmp.ne.s32.totalorder %s20_s16, %s90_s19  ;;  %p95_p1 = scmp.lt.s32.totalorder %s20_s16, %s20_s16 }
   0x7   :  { %p96_p2 = scmp.lt.s32.totalorder %s90_s19, %s90_s19 }
   0x9   :  { %p97_p3 = por %p96_p2, %p95_p1 }
   0xb   :  { %p98_p4 = pnand %p97_p3, %p91_p0 }
   0xd   :  { %101 = shalt.err (!%p98_p4)
}
   0xe   :  { %22 = dma.hbm_to_vmem [thread:$0]  %s209_s0, 128, %s20_s16, [#allocation3]  }
   0xf   :  { %s112_s22 = scalar_lea.vmem %s33_s18, 128  ;;  %p117_p6 = scmp.lt.s32.totalorder %s33_s18, %s33_s18 }
  0x10   :  { %p113_p5 = scmp.ne.s32.totalorder %s33_s18, %s112_s22  ;;  %p118_p7 = scmp.lt.s32.totalorder %s112_s22, %s112_s22 }
  0x12   :  { %p119_p8 = por %p118_p7, %p117_p6 }
  0x14   :  { %p120_p9 = pnand %p119_p8, %p113_p5 }
  0x16   :  { %123 = shalt.err (!%p120_p9)
}
  0x17   :  { %35 = dma.hbm_to_vmem [thread:$0]  %s77_s14, 128, %s33_s18, [#allocation6]  }
  0x18   :  { %165 = dma.done.wait [#allocation3], 128  }
  0x19   :  { %166 = vsyncadd [#allocation3], 4294967168 }
  0x1a   :  { %167 = dma.done.wait [#allocation6], 128  }
  0x1b   :  { %168 = vsyncadd [#allocation6], 4294967168  ;;  %s175_s1 = smov [#allocation7]   ;;  %s176_s24 = smov [#allocation8]   ;;  %v43_v0 = vld [vmem:[#allocation2] sm:$0xff]  ;;  %v45_v1 = vld [vmem:[#allocation5] sm:$0xff] }
  0x1c   :  { %s53_s23 = sshll.u32 %s175_s1, 4  ;;  %s63_s25 = sshll.u32 %s176_s24, 4  ;;  %44 = vst [vmem:[#allocation7] sm:$0xff] %v43_v0  ;;  %46 = vst [vmem:[#allocation8] sm:$0xff] %v45_v1  ;;  %s54_s23 = int_to_ptr.vmem [resolvable:$true] %s53_s23  ;;  %s64_s25 = int_to_ptr.vmem [resolvable:$true] %s63_s25 }
  0x1d   :  { %s125_s0 = scalar_lea.vmem %s54_s23, 128  ;;  %p130_p11 = scmp.lt.s32.totalorder %s54_s23, %s54_s23 }
  0x1e   :  { %p126_p10 = scmp.ne.s32.totalorder %s54_s23, %s125_s0  ;;  %p131_p12 = scmp.lt.s32.totalorder %s125_s0, %s125_s0 }
  0x20   :  { %p132_p13 = por %p131_p12, %p130_p11 }
  0x22   :  { %p133_p0 = pnand %p132_p13, %p126_p10 }
  0x24   :  { %136 = shalt.err (!%p133_p0)
}
  0x25   :  { %56 = dma.vmem_to_hbm [thread:$0]  %s54_s23, 128, %s211_s2, [#allocation4]  }
  0x26   :  { %s145_s28 = scalar_lea.vmem %s64_s25, 128  ;;  %p150_p2 = scmp.lt.s32.totalorder %s64_s25, %s64_s25 }
  0x27   :  { %p146_p1 = scmp.ne.s32.totalorder %s64_s25, %s145_s28  ;;  %p151_p3 = scmp.lt.s32.totalorder %s145_s28, %s145_s28 }
  0x29   :  { %p152_p4 = por %p151_p3, %p150_p2 }
  0x2b   :  { %p153_p5 = pnand %p152_p4, %p146_p1 }
  0x2d   :  { %156 = shalt.err (!%p153_p5)
}
  0x2e   :  { %66 = dma.vmem_to_hbm [thread:$0]  %s64_s25, 128, %s212_s3, [#allocation9]  }
  0x2f   :  { %169 = dma.done.wait [#allocation4], 128  }
  0x30   :  { %170 = vsyncadd [#allocation4], 4294967168 }
  0x31   :  { %171 = dma.done.wait [#allocation9], 128  }
  0x32   :  { %172 = vsyncadd [#allocation9], 4294967168 }
  0x33   :  { %73 = vsyncpa [#allocation3], 1 }
  0x34   :  { %74 = vsyncpa [#allocation6], 1 }
  0x35   :  { %75 = vsyncpa [#allocation4], 1 }
  0x36   :  { %76 = vsyncpa [#allocation9], 1 }

</bundles_post_ra>
